<compile_context>
chip_gen: v7x
topology: tpu7x:2x2x1
jax: 0.10.0
libtpu: 0.0.40
codegen_flags: <defaults>
</compile_context>

<pallas_src>
import math

import jax
import jax.numpy as jnp
from jax.experimental import pallas as pl
from jax.experimental.pallas import tpu as pltpu

EPS = -1e-08
MASK = -1.0

# TODO(synk): get_fgsims / get_fgmask / get_mask are not part of the provided
# spec; this implementation assumes the standard definitions (fine-grained
# dot-product similarities + per-length boolean masks) used by this codebase.


def _round_up(x, m):
    return ((x + m - 1) // m) * m


def _subspace_kernel(imgs_ref, caps_ref, wmask_ref, o_ref):
    # imgs_ref : (1, R, D)     region-masked image features of image i
    # caps_ref : (D, CL)       caption tile, (caption, word) fused into lanes, bf16
    # wmask_ref: (1, CL)       1.0 where the word is valid, else 0.0
    # o_ref    : (1, 1, 1, CL) lane-dense output block
    f32 = jnp.float32
    bf16 = jnp.bfloat16

    v = imgs_ref[0].astype(f32)          # (R, D)
    vt = v.T                             # (D, R) single in-kernel transpose per step
    ct = caps_ref[...]                   # (D, CL) bf16

    # S^T[r, col] = sum_d imgs[r, d] * caps[col, d]   (col = caption*L_pad + word)
    st = jnp.dot(v.astype(bf16), ct, preferred_element_type=f32)        # (R, CL)
    # A^T[d, col] = sum_r imgs[r, d] * S^T[r, col]    (attended image vectors)
    at = jnp.dot(vt.astype(bf16), st.astype(bf16),
                 preferred_element_type=f32)                            # (D, CL)

    ct32 = ct.astype(f32)
    num = jnp.sum(at * ct32, axis=0, keepdims=True)                     # (1, CL)
    den = jnp.sqrt(jnp.sum(at * at, axis=0, keepdims=True)) + EPS       # (1, CL)
    sim = num * pl.reciprocal(den, approx=True)                         # (1, CL)

    o_ref[0, 0] = jnp.where(wmask_ref[...] > 0.5, sim, MASK).astype(o_ref.dtype)


def subspace_forward(imgs, caps, img_lens, cap_lens, *,
                     cap_tile=None, target_lanes=512):
    """Pallas TPU implementation of Subspace.forward.

    imgs:     (n_img, R, D) image region features
    caps:     (n_cap, L, D) caption word features
    img_lens: (n_img,) valid regions per image
    cap_lens: (n_cap,) valid words per caption
    returns:  (n_img, n_cap, L) float32; MASK (-1) where w >= cap_lens[c].
    """
    n_img, R, D = imgs.shape
    n_cap, L, D2 = caps.shape
    assert D == D2
    img_lens = img_lens.astype(jnp.int32)
    cap_lens = cap_lens.astype(jnp.int32)

    # ---- tile selection: fuse (caption, word) into the lane axis -------------
    L_pad = _round_up(L, 8)
    base = 128 // math.gcd(L_pad, 128)     # smallest tcap with tcap*L_pad % 128 == 0
    if cap_tile is None:
        k = max(1, target_lanes // (base * L_pad))
        tcap = base * k
        tcap = min(tcap, _round_up(max(n_cap, 1), base))  # avoid over-padding tiny batches
    else:
        tcap = _round_up(int(cap_tile), base)
    n_cap_pad = _round_up(n_cap, tcap)
    n_cap_tiles = n_cap_pad // tcap
    CL = tcap * L_pad                      # lanes per grid step (multiple of 128)

    # ---- wrapper-side layout prep --------------------------------------------
    # Zero invalid image regions (== reference's masked_fill of imgs + the
    # region half of the fine-grained mask).
    rmask = jnp.arange(R, dtype=jnp.int32)[None, :] < img_lens[:, None]   # (n_img, R)
    imgs_m = jnp.where(rmask[:, :, None], imgs, 0).astype(imgs.dtype)

    # Caption slab: (n_cap, L, D) -> pad -> (D, n_cap_pad * L_pad), bf16 MXU operand.
    caps_p = jnp.pad(caps, ((0, n_cap_pad - n_cap), (0, L_pad - L), (0, 0)))
    caps_fused = jnp.transpose(caps_p, (2, 0, 1)).reshape(D, n_cap_pad * L_pad)
    caps_fused = caps_fused.astype(jnp.bfloat16)

    # Word-validity mask fused the same way (padded captions/words -> 0 -> MASK).
    wmask = (jnp.arange(L_pad, dtype=jnp.int32)[None, :]
             < cap_lens[:, None]).astype(jnp.float32)                    # (n_cap, L_pad)
    wmask = jnp.pad(wmask, ((0, n_cap_pad - n_cap), (0, 0)))
    wmask_fused = wmask.reshape(1, n_cap_pad * L_pad)

    # ---- VMEM budget (double-buffered blocks) --------------------------------
    caps_blk = D * CL * jnp.dtype(caps_fused.dtype).itemsize
    imgs_blk = R * D * jnp.dtype(imgs_m.dtype).itemsize
    io_blk = 2 * CL * 4
    vmem_limit = int(min(max(4 * (caps_blk + imgs_blk + io_blk) + (8 << 20), 32 << 20),
                         56 << 20))        # stays within v7x's 64 MiB physical VMEM

    grid = (n_cap_tiles, n_img)            # caption tile outer (resident), image inner
    out = pl.pallas_call(
        _subspace_kernel,
        out_shape=jax.ShapeDtypeStruct((n_img, n_cap_tiles, 1, CL), jnp.float32),
        grid_spec=pltpu.PrefetchScalarGridSpec(
            num_scalar_prefetch=0,
            grid=grid,
            in_specs=[
                pl.BlockSpec((1, R, D), lambda c, i: (i, 0, 0)),
                pl.BlockSpec((D, CL), lambda c, i: (0, c)),
                pl.BlockSpec((1, CL), lambda c, i: (0, c)),
            ],
            out_specs=pl.BlockSpec((1, 1, 1, CL), lambda c, i: (i, c, 0, 0)),
        ),
        compiler_params=pltpu.CompilerParams(
            dimension_semantics=("parallel", "parallel"),
            vmem_limit_bytes=vmem_limit,
        ),
    )(imgs_m, caps_fused, wmask_fused)

    out = out.reshape(n_img, n_cap_pad, L_pad)
    return out[:, :n_cap, :L]


class Subspace:
    """Mirrors the PyTorch module; temperature/KNN/split do not affect the
    forward output (split only chunks the caption axis in torch)."""

    def __init__(self, temperature=0.1, KNN=5, split=4):
        self.temperature = temperature
        self.KNN = KNN
        self.split = split

    def __call__(self, imgs, caps, img_lens, cap_lens):
        return subspace_forward(imgs, caps, img_lens, cap_lens)


def _reference(imgs, caps, img_lens, cap_lens):
    """Pure-JAX port of the PyTorch forward (standard helper semantics)."""
    n_img, R, _ = imgs.shape
    n_cap, L, _ = caps.shape
    hi = jax.lax.Precision.HIGHEST
    rmask = jnp.arange(R)[None, :] < img_lens[:, None]                  # (n_img, R)
    wmask = jnp.arange(L)[None, :] < cap_lens[:, None]                  # (n_cap, L)
    fg = jnp.einsum('cwd,ird->ciwr', caps, imgs, precision=hi)          # (c,i,w,r)
    fgmask = wmask[:, None, :, None] & rmask[None, :, None, :]
    fg = jnp.where(fgmask, fg, 0.0)
    imgs_m = jnp.where(rmask[:, :, None], imgs, 0.0)
    caps_m = jnp.where(wmask[:, :, None], caps, 0.0)
    a = jnp.einsum('ciwr,ird->ciwd', fg, imgs_m, precision=hi)          # (c,i,w,d)
    num = jnp.sum(a * caps_m[:, None, :, :], axis=-1)                   # (c,i,w)
    den = jnp.sqrt(jnp.sum(a * a, axis=-1)) + EPS
    sims = num / den
    sims = jnp.where(wmask[:, None, :], sims, MASK)
    return jnp.transpose(sims, (1, 0, 2)).astype(jnp.float32)           # (i,c,w)


if __name__ == "__main__":
    key = jax.random.PRNGKey(0)
    k1, k2, k3, k4 = jax.random.split(key, 4)
    n_img, R, D = 4, 8, 32     # images, regions per image, feature dim
    n_cap, L = 6, 16           # captions, max words per caption
    imgs = jax.random.normal(k1, (n_img, R, D), dtype=jnp.float32)
    caps = jax.random.normal(k2, (n_cap, L, D), dtype=jnp.float32)
    img_lens = jax.random.randint(k3, (n_img,), 2, R + 1)
    cap_lens = jax.random.randint(k4, (n_cap,), 2, L + 1)

    model = Subspace(temperature=0.1, KNN=5, split=4)
    out = model(imgs, caps, img_lens, cap_lens)
    out = jax.block_until_ready(out)

    ref = _reference(imgs, caps, img_lens, cap_lens)
    assert out.shape == (n_img, n_cap, L)
    # bf16 MXU operands + approx reciprocal -> looser tolerance vs f32 HIGHEST ref.
    assert bool(jnp.all(jnp.isclose(out, ref, rtol=5e-2, atol=5e-2))), \
        "mismatch vs reference"

    print("KERNEL_OK")
</pallas_src>

<mosaic_0001>
module attributes {stable_mosaic.version = 11 : i64} {
  func.func @_subspace_kernel(%arg0: i32, %arg1: i32, %arg2: memref<1x8x32xf32, #tpu.memory_space<vmem>>, %arg3: memref<32x128xbf16, #tpu.memory_space<vmem>>, %arg4: memref<1x128xf32, #tpu.memory_space<vmem>>, %arg5: memref<1x1x1x128xf32, #tpu.memory_space<vmem>>) attributes {dimension_semantics = [#tpu.dimension_semantics<parallel>, #tpu.dimension_semantics<parallel>], iteration_bounds = array<i64: 1, 4>, scalar_prefetch = 0 : i64, scratch_operands = 0 : i64, tpu.core_type = #tpu.core_type<tc>, window_params = [{transform_indices = @transform_0, window_bounds = array<i64: 1, 8, 32>}, {transform_indices = @transform_1, window_bounds = array<i64: 32, 128>}, {transform_indices = @transform_2, window_bounds = array<i64: 1, 128>}, {transform_indices = @transform_3, window_bounds = array<i64: 1, 1, 1, 128>}]} {
    %c0 = arith.constant 0 : index
    %c0_0 = arith.constant 0 : index
    %c0_1 = arith.constant 0 : index
    %0 = vector.load %arg2[%c0, %c0_0, %c0_1] : memref<1x8x32xf32, #tpu.memory_space<vmem>>, vector<1x8x32xf32>
    %1 = vector.shape_cast %0 : vector<1x8x32xf32> to vector<8x32xf32>
    %2 = tpu.transpose %1, [1, 0] : vector<8x32xf32> -> vector<32x8xf32>
    %c0_2 = arith.constant 0 : index
    %c0_3 = arith.constant 0 : index
    %3 = vector.load %arg3[%c0_2, %c0_3] : memref<32x128xbf16, #tpu.memory_space<vmem>>, vector<32x128xbf16>
    %4 = arith.truncf %1 : vector<8x32xf32> to vector<8x32xbf16>
    %cst = arith.constant dense<0.000000e+00> : vector<8x128xf32>
    %5 = tpu.matmul %4, %3, %cst {dimension_numbers = #tpu.dot_dimension_numbers<[1], [0], [0], [1], [0, 0, 1, 1], [], []>} : vector<8x32xbf16>, vector<32x128xbf16>, vector<8x128xf32> -> vector<8x128xf32>
    %6 = arith.truncf %2 : vector<32x8xf32> to vector<32x8xbf16>
    %7 = arith.truncf %5 : vector<8x128xf32> to vector<8x128xbf16>
    %cst_4 = arith.constant dense<0.000000e+00> : vector<32x128xf32>
    %8 = tpu.matmul %6, %7, %cst_4 {dimension_numbers = #tpu.dot_dimension_numbers<[1], [0], [0], [1], [0, 0, 1, 1], [], []>} : vector<32x8xbf16>, vector<8x128xbf16>, vector<32x128xf32> -> vector<32x128xf32>
    %9 = arith.extf %3 : vector<32x128xbf16> to vector<32x128xf32>
    %10 = arith.mulf %8, %9 : vector<32x128xf32>
    %cst_5 = arith.constant dense<0.000000e+00> : vector<128xf32>
    %11 = vector.multi_reduction <add>, %10, %cst_5 [0] : vector<32x128xf32> to vector<128xf32>
    %12 = vector.shape_cast %11 : vector<128xf32> to vector<1x128xf32>
    %13 = arith.mulf %8, %8 : vector<32x128xf32>
    %cst_6 = arith.constant dense<0.000000e+00> : vector<128xf32>
    %14 = vector.multi_reduction <add>, %13, %cst_6 [0] : vector<32x128xf32> to vector<128xf32>
    %15 = vector.shape_cast %14 : vector<128xf32> to vector<1x128xf32>
    %16 = math.sqrt %15 : vector<1x128xf32>
    %cst_7 = arith.constant -9.99999993E-9 : f32
    %17 = vector.broadcast %cst_7 : f32 to vector<1x128xf32>
    %18 = arith.addf %16, %17 : vector<1x128xf32>
    %19 = tpu.reciprocal %18 {approx = true} : vector<1x128xf32> -> vector<1x128xf32>
    %20 = arith.mulf %12, %19 : vector<1x128xf32>
    %c0_8 = arith.constant 0 : index
    %c0_9 = arith.constant 0 : index
    %21 = vector.load %arg4[%c0_8, %c0_9] : memref<1x128xf32, #tpu.memory_space<vmem>>, vector<1x128xf32>
    %cst_10 = arith.constant 5.000000e-01 : f32
    %22 = vector.broadcast %cst_10 : f32 to vector<1x128xf32>
    %23 = arith.cmpf ogt, %21, %22 : vector<1x128xf32>
    %cst_11 = arith.constant -1.000000e+00 : f32
    %24 = vector.broadcast %cst_11 : f32 to vector<1x128xf32>
    %25 = arith.select %23, %20, %24 : vector<1x128xi1>, vector<1x128xf32>
    %c0_12 = arith.constant 0 : index
    %c0_13 = arith.constant 0 : index
    %c0_14 = arith.constant 0 : index
    %c0_15 = arith.constant 0 : index
    %26 = vector.load %arg5[%c0_12, %c0_13, %c0_14, %c0_15] : memref<1x1x1x128xf32, #tpu.memory_space<vmem>>, vector<1x1x1x128xf32>
    %27 = vector.shape_cast %26 : vector<1x1x1x128xf32> to vector<1x128xf32>
    %28 = vector.shape_cast %25 : vector<1x128xf32> to vector<1x1x1x128xf32>
    tpu.vector_store %arg5[%c0_12, %c0_13, %c0_14, %c0_15], %28 {strides = array<i32>} : memref<1x1x1x128xf32, #tpu.memory_space<vmem>>, vector<1x1x1x128xf32>,
    return
  }
  func.func @transform_0(%arg0: i32, %arg1: i32) -> (i32, i32, i32) {
    %c0_i32 = arith.constant 0 : i32
    %c0_i32_0 = arith.constant 0 : i32
    %c0_i32_1 = arith.constant 0 : i32
    return %arg1, %c0_i32, %c0_i32_0 : i32, i32, i32
  }
  func.func @transform_1(%arg0: i32, %arg1: i32) -> (i32, i32) {
    %c0_i32 = arith.constant 0 : i32
    %c0_i32_0 = arith.constant 0 : i32
    return %c0_i32, %arg0 : i32, i32
  }
  func.func @transform_2(%arg0: i32, %arg1: i32) -> (i32, i32) {
    %c0_i32 = arith.constant 0 : i32
    %c0_i32_0 = arith.constant 0 : i32
    return %c0_i32, %arg0 : i32, i32
  }
  func.func @transform_3(%arg0: i32, %arg1: i32) -> (i32, i32, i32, i32) {
    %c0_i32 = arith.constant 0 : i32
    %c0_i32_0 = arith.constant 0 : i32
    %c0_i32_1 = arith.constant 0 : i32
    return %arg1, %arg0, %c0_i32, %c0_i32_0 : i32, i32, i32, i32
  }
}

</mosaic_0001>

<bundles_post_ra>
// kernel: tpu_custom_call.1
= control target key start
LH: loop header
LB: loop body
LE: loop exit
PB: predicated region body
PF: predicated region fallthrough
CT: control target
= control target key end

     0   :  { %8 = vsyncpa [#allocation3], 0  ;;  %s1064_s0 = inlined_call_operand.hbm [shape: f32[4,8,32], index: 0, kind: input, shape index: {}]   ;;  %s1065_s1 = inlined_call_operand.hbm [shape: bf16[32,128], index: 1, kind: input, shape index: {}]   ;;  %s1066_s2 = inlined_call_operand.vmem [shape: f32[1,128], index: 2, kind: input, shape index: {}]   ;;  %s1067_s3 = inlined_call_operand.hbm [shape: f32[4,1,1,128], index: 3, kind: output, shape index: {}]  }
   0x1   :  { %10 = vsyncpa [#allocation3 + $0x1], 0 }
   0x2   :  { %11 = vsyncpa [#allocation6], 0 }
   0x3   :  { %12 = vsyncpa [#allocation4], 0 }
   0x4   :  { %14 = vsyncpa [#allocation4 + $0x1], 0  ;;  %s848_s12 = smov 0   ;;  %s850_s13 = smov 0  }
   0x5   :  { %s852_s14 = smov 0   ;;  %s854_s15 = smov 0  }
   0x6   :  { %s856_s16 = smov 0   ;;  %s858_s17 = smov 0  }
   0x7 LB: > { %s550_s18 = sadd.s32 4294967295, %s819_s17   ;;  %s551_s19 = sadd.s32 4294967294, %s819_s17   ;;  %s819_s17 = sphi %s858_s17, %s20_s17   ;;  %s815_s16 = sphi %s856_s16, %s1090_s16   ;;  %s811_s15 = sphi %s854_s15, %s1089_s15   ;;  %s807_s14 = sphi %s852_s14, %s1088_s14   ;;  %s803_s13 = sphi %s850_s13, %s1087_s13   ;;  %s799_s12 = sphi %s848_s12, %s1086_s12  }
   0x8   : > { %p52_p0 = scmp.ne.s32.totalorder %s803_s13, %s799_s12  ;;  %p882_p1 = scmp.eq.s32.totalorder %s550_s18, 0 }
   0x9   : > { %p886_p2 = scmp.eq.s32.totalorder %s550_s18, 3  ;;  %p136_p3 = scmp.eq.s32.totalorder %s551_s19, 3 }
   0xa   : > { %s1072_s20 = scalar_select %p882_p1, 1, 0 }
   0xb   : > { %s1073_s21 = scalar_select %p886_p2, 1, 0 }
   0xc   : > { %p892_p4 = por %p882_p1, %p52_p0  ;;  %p552_p5 = scmp.ge.s32.totalorder %s819_s17, 1 }
   0xd   : > { %p897_p6 = por %p136_p3, %p52_p0  ;;  %p143_p7 = scmp.lt.s32.totalorder %s819_s17, 5 }
   0xe   : > { %s1074_s22 = scalar_select %p892_p4, 1, 0 }
   0xf   : > { %s1075_s23 = scalar_select %p897_p6, 1, 0 }
  0x10   : > { %p902_p8 = pnand %p552_p5, %p143_p7  ;;  %s821_s25 = smov [#allocation5]  }
  0x11   : > { %s157_s26 = sshll.u32 %s821_s25, 4  ;;  %s29_s28 = sadd.s32 1, %s815_s16  ;;  %s158_s26 = int_to_ptr.vmem [resolvable:$true] %s157_s26 }
  0x12   : > { %s1076_s24 = scalar_select %p902_p8, 1, 0 }
  0x13   : > { %p598_p9 = pneg %p902_p8  ;;  %s675_s4 = scalar_lea.hbm %s1065_s1, 256 }
  0x14   : > { %p676_p11 = scmp.ne.s32.totalorder %s1065_s1, %s675_s4  ;;  %p682_p3 = scmp.lt.u32.totalorder %s675_s4, %s1065_s1 }
  0x15   : > { %p910_p10 = pnand %p598_p9, %p882_p1 }
  0x17   : > { %p677_p12 = pneg %p910_p10 }
  0x19   : > { %p678_p13 = pnand %p677_p12, %p676_p11 }
  0x1b   : > { %p679_p0 = pneg %p678_p13 }
  0x1d   : > { %p684_p5 = pnand %p682_p3, %p679_p0 }
  0x1f   : > { %687 = shalt.err (!%p684_p5)
}
  0x20   : > { %s688_s9 = scalar_lea.vmem %s158_s26, 256  ;;  %p696_p1 = scmp.lt.s32.totalorder %s158_s26, %s158_s26 }
  0x21   : > { %p689_p7 = scmp.ne.s32.totalorder %s158_s26, %s688_s9  ;;  %p697_p4 = scmp.lt.s32.totalorder %s688_s9, %s688_s9 }
  0x23   : > { %p691_p9 = pnand %p689_p7, %p677_p12  ;;  %p698_p8 = por %p697_p4, %p696_p1 }
  0x25   : > { %p692_p6 = pneg %p691_p9 }
  0x27   : > { %p699_p2 = pnand %p698_p8, %p692_p6 }
  0x29   : > { %702 = shalt.err (!%p699_p2)
}
  0x2a   : > { %s822_s10 = smov 64   ;;  %s823_s11 = smov 4  }
  0x2b   : > { %601 = dma.hbm_to_vmem [thread:$0]  (!%p910_p10), %s1065_s1, 256, %s158_s26, [#allocation6], %s822_s10, %s822_s10, %s823_s11  }
  0x2c   : > { %p30_p1 = scmp.ge.s32.totalorder %s29_s28, 4  ;;  %s39_s25 = sadd.s32 1, %s807_s14 }
  0x2d   : > { %p46_p2 = scmp.ne.s32.totalorder %s807_s14, %s803_s13  ;;  %p47_p4 = scmp.eq.s32.totalorder %s819_s17, 0 }
  0x2e   : > { %s1092_s28 = smov (%p30_p1, %s29_s28), 0  ;;  %p1079_p8 = scmp.ne.s32.totalorder %s1073_s21, 0 }
  0x2f   : > { %p937_p6 = por %p47_p4, %p46_p2  ;;  %s36_s27 = ssub.s32 %s815_s16, %s1092_s28 }
  0x30   : > { %p943_p11 = por %p1079_p8, %p46_p2  ;;  %p611_p12 = scmp.lt.s32.totalorder %s819_s17, 4 }
  0x31   : > { %p37_p10 = scmp.eq.s32.totalorder %s36_s27, 0  ;;  %s177_s26 = sand.u32 1, %s807_s14  }
  0x32   : > { %s556_s4 = sshll.u32 %s177_s26, 3  ;;  %s557_s6 = sshll.u32 %s815_s16, 7 }
  0x33   : > { %s952_s5 = scalar_select %p37_p10, %s807_s14, %s39_s25  }
  0x34   : > { %s958_s9 = scalar_lea.hbm %s1064_s0, %s557_s6  ;;  %s181_s21 = scalar_lea.vmem [#allocation2], %s556_s4 }
  0x35   : > { %s188_s10 = sshll.u32 %s181_s21, 4  ;;  %p964_p13 = pnand %p611_p12, %p937_p6  ;;  %s960_s10 = int_to_ptr.vmem [resolvable:$true] %s188_s10 }
  0x36   : > { %s178_s18 = scalar_lea.sflag [#allocation3], %s177_s26  ;;  %s703_s19 = scalar_lea.hbm %s958_s9, 128 }
  0x37   : > { %p704_p0 = scmp.ne.s32.totalorder %s958_s9, %s703_s19  ;;  %p705_p3 = pneg %p964_p13 }
  0x38   : > { %s708_s4 = scalar_lea.hbm %s1064_s0, 512  ;;  %p709_p9 = scmp.lt.u32.totalorder %s958_s9, %s1064_s0 }
  0x39   : > { %p706_p5 = pnand %p705_p3, %p704_p0  ;;  %p710_p1 = scmp.lt.u32.totalorder %s708_s4, %s703_s19 }
  0x3a   : > { %p712_p4 = scmp.lt.u32.totalorder %s703_s19, %s958_s9 }
  0x3b   : > { %p707_p7 = pneg %p706_p5  ;;  %p711_p2 = por %p710_p1, %p709_p9 }
  0x3d   : > { %p713_p6 = por %p712_p4, %p711_p2 }
  0x3f   : > { %p714_p8 = pnand %p713_p6, %p707_p7 }
  0x41   : > { %717 = shalt.err (!%p714_p8)
}
  0x42   : > { %s718_s26 = scalar_lea.vmem %s960_s10, 128  ;;  %s824_s7 = smov [#allocation2]  }
  0x43   : > { %p719_p12 = scmp.ne.s32.totalorder %s960_s10, %s718_s26  ;;  %s723_s8 = sshll.u32 %s824_s7, 4  ;;  %s724_s8 = int_to_ptr.vmem [resolvable:$false] %s723_s8 }
  0x44   : > { %s725_s21 = scalar_lea.vmem %s724_s8, 256  ;;  %p726_p5 = scmp.lt.s32.totalorder %s960_s10, %s724_s8 }
  0x45   : > { %p721_p10 = pnand %p719_p12, %p705_p3  ;;  %p727_p9 = scmp.lt.s32.totalorder %s725_s21, %s718_s26 }
  0x47   : > { %p722_p0 = pneg %p721_p10  ;;  %p728_p1 = por %p727_p9, %p726_p5 }
  0x49   : > { %p729_p2 = pnand %p728_p1, %p722_p0 }
  0x4b   : > { %732 = shalt.err (!%p729_p2)
}
  0x4c   : > { %605 = dma.hbm_to_vmem [thread:$0]  (!%p964_p13), %s958_s9, 128, %s960_s10, %s178_s18  }
  0x4d   : > { %p1082_p7 = scmp.ne.s32.totalorder %s1076_s24, 0 }
  0x4e   : > { %s996_s19 = sand.u32 (!%p1082_p7), 1, %s803_s13   ;;  %p1083_p3 = scmp.ne.s32.totalorder (!%p1082_p7), %s1074_s22, 0 }
  0x4f   : > { %197 = sbr.rel (%p1082_p7) target bundleno = 597 (0x255), region = 32  ;;  %s559_s25 = sshll.u32 (!%p1082_p7), %s996_s19, 3 }
  0x50   : > { %s200_s27 = scalar_lea.sflag (!%p1082_p7), [#allocation3], %s996_s19  ;;  %s203_s4 = scalar_lea.vmem (!%p1082_p7), [#allocation2], %s559_s25 }
  0x56   : > { %786 = dma.done.wait (%p1083_p3), %s200_s27, 128  }
  0x57   : > { %788 = vsyncadd (%p1083_p3), %s200_s27, 4294967168  ;;  %p1084_p4 = scmp.ne.s32.totalorder %s1072_s20, 0 }
  0x59   : > { %790 = dma.done.wait (%p1084_p4), [#allocation6], 256  }
  0x5a   : > { %792 = vsyncadd (%p1084_p4), [#allocation6], 4294967040  ;;  %v825_v0 = vmov 0.0   ;;  %vm826_vm0 = vmmov 0   ;;  %v269_v1 = vld [vmem:[#allocation5] sm:$0xff]   ;;  %v271_v2 = vld [vmem:[#allocation5 + $0x8] sm:$0xff]  }
  0x5b   : > { %575 = vmatprep.subr.bf16.mxu0 %v825_v0  ;;  %579 = vmatprep.mubr.msk.bf16.mxu0 %vm826_vm0, %v825_v0  ;;  %v236_v3 = vld [vmem:[%s203_s4] sm:$0xff]  ;;  %vm286_vm1 = vcmask 261120   ;;  %vm333_vm2 = vcmask 64512   ;;  %vm340_vm3 = vcmask 1043456   ;;  %v393_v17 = vunpack.c.l.bf16 %v269_v1  ;;  %s566_s24 = sshll.u32 %s811_s15, 4  ;;  %s231_s9 = scalar_lea.vmem [#allocation7], %s996_s19 }
  0x5c   : > { %237 = vxpose.xlu0.b32.start.end [1/1] (short) (narrow) %v236_v3, 32  ;;  %576 = vmatpush3.bf16.msra.mxu0 %v269_v1  ;;  %v273_v4 = vpack.c.bf16 %v236_v3, %v236_v3  ;;  %v394_v19 = vunpack.c.h.bf16 %v269_v1  ;;  %v395_v21 = vunpack.c.l.bf16 %v271_v2  ;;  %v396_v23 = vunpack.c.h.bf16 %v271_v2  ;;  %v433_v56 = vld [vmem:[%s1066_s2] sm:$0x1]  ;;  %s451_s10 = sshll.u32 %s231_s9, 4  ;;  %s1016_s29 = scalar_lea.hbm %s1067_s3, %s566_s24  ;;  %s1018_s10 = int_to_ptr.vmem [resolvable:$true] %s451_s10 }
  0x5d   : > { %577 = vmatprep.subr.bf16.mxu0 %v825_v0  ;;  %vm434_vm6 = vcmp.gt.f32.partialorder %v433_v56, 0.5  ;;  %s438_s6 = scalar_lea.sflag [#allocation4], %s996_s19  ;;  %s733_s26 = scalar_lea.vmem %s1018_s10, 16 }
  0x5e   : > { %p734_p13 = scmp.ne.s32.totalorder %s1018_s10, %s733_s26  ;;  %s827_s15 = smov [#allocation7]  }
  0x5f   : > { %s737_s7 = sshll.u32 %s827_s15, 4  ;;  %s738_s7 = int_to_ptr.vmem [resolvable:$false] %s737_s7 }
  0x60   : > { %578 = vmatpush3.bf16.msra.mxu0 %v271_v2  ;;  %p735_p6 = pnand %p734_p13, %p943_p11  ;;  %s739_s8 = scalar_lea.vmem %s738_s7, 32 }
  0x61   : > { %p740_p12 = scmp.lt.s32.totalorder %s1018_s10, %s738_s7  ;;  %p741_p10 = scmp.lt.s32.totalorder %s739_s8, %s733_s26 }
  0x62   : > { %p736_p8 = pneg %p735_p6 }
  0x63   : > { %580 = vmatmul.mubr.msk.bf16.vlgmr.msra.gmra.mrb[0].mxu0 %vm286_vm1, %v273_v4  ;;  %p742_p0 = por %p741_p10, %p740_p12 }
  0x65   : > { %p743_p5 = pnand %p742_p0, %p736_p8 }
  0xdc   : > { %v253_v5 = vpop.trf.xlu0 }
  0xe0   : > { %v254_v6 = vpop.trf.xlu0 }
  0xe1   : > { %v330_v7 = vpack.c.bf16 %v254_v6, %v253_v5 }
  0xe3   : > { %585 = vmatprep.mubr.msk.bf16.mxu1 %vm333_vm2, %v330_v7 }
  0xe4   : > { %v255_v8 = vpop.trf.xlu0 }
  0xe8   : > { %v256_v12 = vpop.trf.xlu0 }
  0xe9   : > { %v331_v16 = vpack.c.bf16 %v256_v12, %v255_v8 }
 0x136   : > { %v324_v9 = vpop.f32.mrb[0].mxu0 }
 0x137   : > { %v332_v10 = vpack.c.bf16 %v324_v9, %v324_v9  ;;  %v581_v11 = vpop.f32.mrb[1].mxu0 }
 0x138   : > { %v327_v13 = vpop.f32.mrb[2].mxu0 }
 0x139   : > { %v582_v14 = vpop.f32.mrb[3].mxu0  ;;  %589 = vmatprep.subr.msk.bf16.mxu1 %vm340_vm3, %v332_v10  ;;  %v342_v15 = vsel %vm340_vm3, %v332_v10, 0 }
 0x13a   : > { %584 = vmatpush3.bf16.msra.mxu1 %v342_v15 }
 0x13d   : > { %586 = vmatmul.mubr.msk.bf16.vlgmr.msra.gmra.mrb[0].mxu1 %vm333_vm2, %v331_v16 }
 0x210   : > { %v587_v18 = vpop.f32.mrb[0].mxu1 }
 0x211   : > { %v378_v20 = vpop.f32.mrb[1].mxu1  ;;  %v399_v29 = vmul.f32 %v587_v18, %v395_v21  ;;  %v412_v30 = vmul.f32 %v587_v18, %v587_v18 }
 0x212   : > { %v588_v22 = vpop.f32.mrb[2].mxu1  ;;  %v397_v25 = vmul.f32 %v393_v17, %v378_v20  ;;  %v410_v26 = vmul.f32 %v378_v20, %v378_v20 }
 0x213   : > { %v381_v24 = vpop.f32.mrb[3].mxu1  ;;  %v400_v33 = vmul.f32 %v588_v22, %v396_v23  ;;  %v413_v34 = vmul.f32 %v588_v22, %v588_v22 }
 0x214   : > { %v398_v27 = vmul.f32 %v394_v19, %v381_v24  ;;  %v411_v28 = vmul.f32 %v381_v24, %v381_v24 }
 0x216   : > { %v401_v31 = vadd.f32 %v398_v27, %v397_v25  ;;  %v414_v32 = vadd.f32 %v411_v28, %v410_v26 }
 0x218   : > { %v402_v35 = vadd.f32 %v401_v31, %v399_v29  ;;  %v415_v36 = vadd.f32 %v414_v32, %v412_v30 }
 0x21a   : > { %v403_v37 = vadd.f32 %v402_v35, %v400_v33  ;;  %v416_v38 = vadd.f32 %v415_v36, %v413_v34 }
 0x21c   : > { %v417_v39 = vrot.slane %v416_v38, 4  ;;  %v404_v45 = vrot.slane %v403_v37, 4 }
 0x21e   : > { %v418_v40 = vadd.f32 %v417_v39, %v416_v38  ;;  %v405_v47 = vadd.f32 %v404_v45, %v403_v37 }
 0x220   : > { %v419_v41 = vrot.slane %v418_v40, 2  ;;  %v406_v51 = vrot.slane %v405_v47, 2 }
 0x222   : > { %v420_v42 = vadd.f32 %v419_v41, %v418_v40  ;;  %v407_v54 = vadd.f32 %v406_v51, %v405_v47 }
 0x224   : > { %v421_v43 = vrot.slane %v420_v42, 1  ;;  %v408_v55 = vrot.slane %v407_v54, 1 }
 0x226   : > { %v422_v44 = vadd.f32 %v421_v43, %v420_v42  ;;  %v409_v57 = vadd.f32 %v408_v55, %v407_v54 }
 0x228   : > { %671 = vrsqrt.f32 %v422_v44  ;;  %vm425_vm4 = vcmp.eq.f32.partialorder %v422_v44, inf  ;;  %v428_v49 = vand.u32 2147483648, %v422_v44  ;;  %vm427_vm5 = vcmp.eq.f32.partialorder %v422_v44, 0.0 }
 0x232   : > { %v672_v46 = vpop.eup %671 }
 0x233   : > { %v424_v48 = vmul.f32 %v672_v46, %v422_v44 }
 0x235   : > { %v426_v50 = vsel %vm425_vm4, %v422_v44, %v424_v48 }
 0x236   : > { %v429_v52 = vsel %vm427_vm5, %v428_v49, %v426_v50 }
 0x237   : > { %v430_v53 = vadd.f32 -1e-08, %v429_v52 }
 0x239   : > { %673 = vrcp.f32 %v430_v53 }
 0x243   : > { %v674_v58 = vpop.eup %673 }
 0x244   : > { %v432_v59 = vmul.f32 %v674_v58, %v409_v57 }
 0x246   : > { %v435_v60 = vsel %vm434_vm6, %v432_v59, -1.0 }
 0x247   : > { %436 = vst [vmem:[%s231_s9] sm:$0x1] %v435_v60 }
 0x248   : > { %746 = shalt.err (!%p743_p5)
}
 0x249   : > { %s747_s21 = scalar_lea.hbm %s1016_s29, 16  ;;  %s751_s27 = scalar_lea.hbm %s1067_s3, 64 }
 0x24a   : > { %p748_p9 = scmp.ne.s32.totalorder %s1016_s29, %s747_s21  ;;  %p752_p7 = scmp.lt.u32.totalorder %s1016_s29, %s1067_s3 }
 0x24b   : > { %p753_p3 = scmp.lt.u32.totalorder %s751_s27, %s747_s21  ;;  %p755_p13 = scmp.lt.u32.totalorder %s747_s21, %s1016_s29 }
 0x24c   : > { %p749_p1 = pnand %p748_p9, %p943_p11 }
 0x24d   : > { %p754_p4 = por %p753_p3, %p752_p7 }
 0x24e   : > { %p750_p2 = pneg %p749_p1 }
 0x24f   : > { %p756_p6 = por %p755_p13, %p754_p4 }
 0x251   : > { %p757_p8 = pnand %p756_p6, %p750_p2 }
 0x253   : > { %760 = shalt.err (!%p757_p8)
}
 0x254   : > { %596 = dma.vmem_to_hbm [thread:$0]  (%p943_p11), %s1018_s10, 16, %s1016_s29, %s438_s6  }
 0x255 PF: > { %p613_p12 = scmp.ge.s32.totalorder %s819_s17, 2  ;;  %s463_s22 = sand.u32 1, %s799_s12  }
 0x256   : > { %p1085_p10 = scmp.ne.s32.totalorder %s1075_s23, 0  ;;  %s464_s24 = scalar_lea.sflag [#allocation4], %s463_s22 }
 0x258   : > { %p607_p0 = pnand %p613_p12, %p1085_p10 }
 0x25a   : > { %794 = dma.done.wait (!%p607_p0), %s464_s24, 16  }
 0x25b   : > { %796 = vsyncadd (!%p607_p0), %s464_s24, 4294967280  ;;  %s20_s17 = sadd.s32 1, %s819_s17   ;;  %s1086_s12 = smov %s803_s13 }
 0x25c   : > { %p17_p5 = scmp.ge.s32.totalorder %s20_s17, 6   ;;  %s1087_s13 = smov %s807_s14 }
 0x25d   : > { %s1088_s14 = smov %s952_s5  ;;  %s1089_s15 = smov %s815_s16 }
 0x25e   : > { %s1090_s16 = smov %s1092_s28  ;;  %19 = sbr.rel (!%p17_p5) target bundleno = 7 (0x7), region = 85 }
 0x265   :  { %468 = vsyncpa [#allocation3], 1 }
 0x266   :  { %470 = vsyncpa [#allocation3 + $0x1], 1 }
 0x267   :  { %471 = vsyncpa [#allocation6], 1 }
 0x268   :  { %472 = vsyncpa [#allocation4], 1 }
 0x269   :  { %474 = vsyncpa [#allocation4 + $0x1], 1 }

</bundles_post_ra>
